<compile_context>
chip_gen: v6e
topology: v6e:2x2x1
jax: 0.10.0
libtpu: 0.0.40
codegen_flags: <defaults>
</compile_context>

<pallas_src>
import functools

import jax
import jax.numpy as jnp
from jax.experimental import pallas as pl
from jax.experimental.pallas import tpu as pltpu

# Constants referenced (but not defined) in the original module source.
BEAM_LENGTH = 10.0   # predict() normalization constant
BEAM_COUNT = 4       # number of input features
HIDDEN_SIZE = 32
BATCH = 32           # small demo batch (kernel is designed for B in the thousands)

LANE = 128           # TPU lane width (hidden feature axes of the weights pad to this)
SUBLANE = 8          # f32 sublane width: batch tiles are multiples of this


def _round_up(x, m):
    return ((x + m - 1) // m) * m


def _sigmoid(x):
    """tanh-form sigmoid: one EUP transcendental per vreg instead of exp + divide."""
    return 0.5 * (jnp.tanh(0.5 * x) + 1.0)


def _mlp_kernel(x_ref, w1_ref, b1_ref, w2_ref, b2_ref, w3_ref, b3_ref, o_ref):
    """One (TB, 4) batch tile -> (TB, 2): 3 fused MXU matmuls + sigmoids.

    Hidden axes are zero-padded to 128 lanes in the weights only; padded activation
    columns equal sigmoid(0)=0.5 and are killed by the zero rows of the next
    layer's padded weight, so the 2 real output columns are exact.
    """
    x = x_ref[...]
    h1 = _sigmoid(jnp.dot(x, w1_ref[...], preferred_element_type=jnp.float32)
                  + b1_ref[...])
    h2 = _sigmoid(jnp.dot(h1, w2_ref[...], preferred_element_type=jnp.float32)
                  + b2_ref[...])
    o_ref[...] = _sigmoid(jnp.dot(h2, w3_ref[...], preferred_element_type=jnp.float32)
                          + b3_ref[...])


def init_params(key, beam_count=BEAM_COUNT, hidden_size=HIDDEN_SIZE):
    """torch.nn.Linear-style init (U(-1/sqrt(fan_in), +1/sqrt(fan_in))).
    Weights stored as (in_features, out_features) so the kernel does y = x @ W + b."""
    dims = [
        (beam_count, hidden_size),          # input_layer
        (hidden_size, hidden_size // 2),    # hidden_layer (inferred)
        (hidden_size // 2, 2),              # output_layer
    ]
    params = []
    for (fan_in, fan_out) in dims:
        key, kw, kb = jax.random.split(key, 3)
        bound = 1.0 / (fan_in ** 0.5)
        w = jax.random.uniform(kw, (fan_in, fan_out), jnp.float32, -bound, bound)
        b = jax.random.uniform(kb, (1, fan_out), jnp.float32, -bound, bound)
        params += [w, b]
    return tuple(params)


def pad_params(params, lane=LANE):
    """Pad only the hidden feature axes of the weights to 128 lanes (done once, ~70 KiB).

    - w1 (4, H):    pad N  -> (4, Hp).   K stays 4 so x streams unpadded from HBM.
    - w2 (H, H2):   pad K,N -> (Hp, H2p). Zero K-rows cancel sigmoid(0)=0.5 cols of h1.
    - w3 (H2, 2):   pad K  -> (H2p, 2).  Output stays 2-wide (no write amplification).
    """
    w1, b1, w2, b2, w3, b3 = params
    hp = _round_up(w1.shape[1], lane)
    h2p = _round_up(w2.shape[1], lane)
    w1p = jnp.pad(w1, ((0, 0), (0, hp - w1.shape[1])))
    b1p = jnp.pad(b1, ((0, 0), (0, hp - b1.shape[1])))
    w2p = jnp.pad(w2, ((0, hp - w2.shape[0]), (0, h2p - w2.shape[1])))
    b2p = jnp.pad(b2, ((0, 0), (0, h2p - b2.shape[1])))
    w3p = jnp.pad(w3, ((0, h2p - w3.shape[0]), (0, 0)))
    return (w1p, b1p, w2p, b2p, w3p, b3)


@functools.partial(jax.jit, static_argnames=("block_batch",))
def generative_model_forward(x, padded_params, *, block_batch=None):
    """x: (B, BEAM_COUNT) float32.  padded_params: output of pad_params().
    Returns (B, 2) float32."""
    w1, b1, w2, b2, w3, b3 = padded_params
    B, F = x.shape
    out_dim = w3.shape[1]                 # 2 (true output width, never lane-padded)

    # Batch tile: multiple of 8 sublanes, large enough to amortize ~0.35 us/step
    # pipeline overhead, but capped at half the (rounded) batch so the "parallel"
    # grid axis always has >= 2 steps to feed both TensorCores on v7x.
    b8 = _round_up(B, SUBLANE)
    if block_batch is None:
        block_batch = max(SUBLANE, min(4096, b8 // 2))
    tb = max(SUBLANE, _round_up(block_batch, SUBLANE))
    tb = min(tb, b8)
    b_pad = _round_up(b8, tb)

    # Pad the batch axis only (feature axis stays at 4; padded rows are sliced off).
    x_p = x.astype(jnp.float32)
    if b_pad != B:
        x_p = jnp.pad(x_p, ((0, b_pad - B), (0, 0)))

    # Constant weights/biases: block index (0, 0) every step -> stay VMEM-resident.
    const = lambda a: pl.BlockSpec(a.shape, lambda i: (0, 0))
    # TODO(synk): pipeline_mode=pl.Buffered(1) on the const specs would save one
    # redundant weight buffer (~190 KiB of VMEM); omitted for maximum portability.

    grid = (b_pad // tb,)
    weight_bytes = sum(int(p.size) * 4 for p in padded_params)
    cost = pl.CostEstimate(
        flops=2 * b_pad * (F * w1.shape[1]
                           + w2.shape[0] * w2.shape[1]
                           + w3.shape[0] * out_dim),
        transcendentals=b_pad * (w1.shape[1] + w2.shape[1] + out_dim),
        bytes_accessed=int(x_p.size) * 4 + b_pad * out_dim * 4 + weight_bytes,
    )

    out_p = pl.pallas_call(
        _mlp_kernel,
        out_shape=jax.ShapeDtypeStruct((b_pad, out_dim), jnp.float32),
        grid=grid,
        in_specs=[
            pl.BlockSpec((tb, F), lambda i: (i, 0)),       # x streamed unpadded (tb, 4)
            const(w1), const(b1),
            const(w2), const(b2),
            const(w3), const(b3),
        ],
        out_specs=pl.BlockSpec((tb, out_dim), lambda i: (i, 0)),  # (tb, 2) store, no lane pad
        compiler_params=pltpu.CompilerParams(
            dimension_semantics=("parallel",),             # shards steps across TCs on v7x
        ),
        cost_estimate=cost,
    )(x_p, w1, b1, w2, b2, w3, b3)

    return out_p if b_pad == B else out_p[:B]


def reference_forward(x, params):
    """Pure-JAX reference of the same forward pass (unpadded weights)."""
    w1, b1, w2, b2, w3, b3 = params
    h1 = jax.nn.sigmoid(x @ w1 + b1)
    h2 = jax.nn.sigmoid(h1 @ w2 + b2)
    return jax.nn.sigmoid(h2 @ w3 + b3)


if __name__ == "__main__":
    key = jax.random.PRNGKey(0)
    key, kx = jax.random.split(key)

    # Simulated lidar scans, normalized by BEAM_SIZE like predict() does.
    raw_scans = jax.random.uniform(kx, (BATCH, BEAM_COUNT), jnp.float32, 0.0, BEAM_LENGTH)
    x = raw_scans / BEAM_LENGTH

    params = init_params(key)
    padded_params = pad_params(params)

    # Default tiling: B=32 -> tb=16 -> grid=(2,) (both v7x TCs get work).
    out = jax.block_until_ready(generative_model_forward(x, padded_params))
    ref = reference_forward(x, params)
    assert out.shape == (BATCH, 2), out.shape
    assert jnp.allclose(out, ref, atol=1e-5, rtol=1e-5), "mismatch vs reference"

    # Ragged batch + small explicit tile: exercises batch padding / final slice.
    x2 = x[:13]
    out2 = jax.block_until_ready(
        generative_model_forward(x2, padded_params, block_batch=8))
    assert out2.shape == (13, 2), out2.shape
    assert jnp.allclose(out2, reference_forward(x2, params), atol=1e-5, rtol=1e-5), \
        "ragged-batch mismatch vs reference"

    print("KERNEL_OK")
</pallas_src>

<mosaic_0001>
module attributes {stable_mosaic.version = 11 : i64} {
  func.func @_mlp_kernel(%arg0: i32, %arg1: memref<16x4xf32, #tpu.memory_space<vmem>>, %arg2: memref<4x128xf32, #tpu.memory_space<vmem>>, %arg3: memref<1x128xf32, #tpu.memory_space<vmem>>, %arg4: memref<128x128xf32, #tpu.memory_space<vmem>>, %arg5: memref<1x128xf32, #tpu.memory_space<vmem>>, %arg6: memref<128x2xf32, #tpu.memory_space<vmem>>, %arg7: memref<1x2xf32, #tpu.memory_space<vmem>>, %arg8: memref<16x2xf32, #tpu.memory_space<vmem>>) attributes {dimension_semantics = [#tpu.dimension_semantics<parallel>], iteration_bounds = array<i64: 2>, scalar_prefetch = 0 : i64, scratch_operands = 0 : i64, tpu.core_type = #tpu.core_type<tc>, window_params = [{transform_indices = @transform_0, window_bounds = array<i64: 16, 4>}, {pipeline_mode = #tpu.pipeline_mode<synchronous>, transform_indices = @transform_1, window_bounds = array<i64: 4, 128>}, {pipeline_mode = #tpu.pipeline_mode<synchronous>, transform_indices = @transform_2, window_bounds = array<i64: 1, 128>}, {pipeline_mode = #tpu.pipeline_mode<synchronous>, transform_indices = @transform_3, window_bounds = array<i64: 128, 128>}, {pipeline_mode = #tpu.pipeline_mode<synchronous>, transform_indices = @transform_4, window_bounds = array<i64: 1, 128>}, {pipeline_mode = #tpu.pipeline_mode<synchronous>, transform_indices = @transform_5, window_bounds = array<i64: 128, 2>}, {pipeline_mode = #tpu.pipeline_mode<synchronous>, transform_indices = @transform_6, window_bounds = array<i64: 1, 2>}, {transform_indices = @transform_7, window_bounds = array<i64: 16, 2>}]} {
    %c0 = arith.constant 0 : index
    %c0_0 = arith.constant 0 : index
    %0 = vector.load %arg1[%c0, %c0_0] : memref<16x4xf32, #tpu.memory_space<vmem>>, vector<16x4xf32>
    %c0_1 = arith.constant 0 : index
    %c0_2 = arith.constant 0 : index
    %1 = vector.load %arg2[%c0_1, %c0_2] : memref<4x128xf32, #tpu.memory_space<vmem>>, vector<4x128xf32>
    %cst = arith.constant dense<0.000000e+00> : vector<16x128xf32>
    %2 = tpu.matmul %0, %1, %cst {dimension_numbers = #tpu.dot_dimension_numbers<[1], [0], [0], [1], [0, 0, 1, 1], [], []>} : vector<16x4xf32>, vector<4x128xf32>, vector<16x128xf32> -> vector<16x128xf32>
    %c0_3 = arith.constant 0 : index
    %c0_4 = arith.constant 0 : index
    %3 = vector.load %arg3[%c0_3, %c0_4] : memref<1x128xf32, #tpu.memory_space<vmem>>, vector<1x128xf32>
    %4 = vector.broadcast %3 : vector<1x128xf32> to vector<16x128xf32>
    %5 = arith.addf %2, %4 : vector<16x128xf32>
    %cst_5 = arith.constant 5.000000e-01 : f32
    %6 = vector.broadcast %cst_5 : f32 to vector<16x128xf32>
    %7 = arith.mulf %6, %5 : vector<16x128xf32>
    %8 = math.tanh %7 : vector<16x128xf32>
    %cst_6 = arith.constant 1.000000e+00 : f32
    %9 = vector.broadcast %cst_6 : f32 to vector<16x128xf32>
    %10 = arith.addf %8, %9 : vector<16x128xf32>
    %cst_7 = arith.constant 5.000000e-01 : f32
    %11 = vector.broadcast %cst_7 : f32 to vector<16x128xf32>
    %12 = arith.mulf %11, %10 : vector<16x128xf32>
    %c0_8 = arith.constant 0 : index
    %c0_9 = arith.constant 0 : index
    %13 = vector.load %arg4[%c0_8, %c0_9] : memref<128x128xf32, #tpu.memory_space<vmem>>, vector<128x128xf32>
    %cst_10 = arith.constant dense<0.000000e+00> : vector<16x128xf32>
    %14 = tpu.matmul %12, %13, %cst_10 {dimension_numbers = #tpu.dot_dimension_numbers<[1], [0], [0], [1], [0, 0, 1, 1], [], []>} : vector<16x128xf32>, vector<128x128xf32>, vector<16x128xf32> -> vector<16x128xf32>
    %c0_11 = arith.constant 0 : index
    %c0_12 = arith.constant 0 : index
    %15 = vector.load %arg5[%c0_11, %c0_12] : memref<1x128xf32, #tpu.memory_space<vmem>>, vector<1x128xf32>
    %16 = vector.broadcast %15 : vector<1x128xf32> to vector<16x128xf32>
    %17 = arith.addf %14, %16 : vector<16x128xf32>
    %cst_13 = arith.constant 5.000000e-01 : f32
    %18 = vector.broadcast %cst_13 : f32 to vector<16x128xf32>
    %19 = arith.mulf %18, %17 : vector<16x128xf32>
    %20 = math.tanh %19 : vector<16x128xf32>
    %cst_14 = arith.constant 1.000000e+00 : f32
    %21 = vector.broadcast %cst_14 : f32 to vector<16x128xf32>
    %22 = arith.addf %20, %21 : vector<16x128xf32>
    %cst_15 = arith.constant 5.000000e-01 : f32
    %23 = vector.broadcast %cst_15 : f32 to vector<16x128xf32>
    %24 = arith.mulf %23, %22 : vector<16x128xf32>
    %c0_16 = arith.constant 0 : index
    %c0_17 = arith.constant 0 : index
    %25 = vector.load %arg6[%c0_16, %c0_17] : memref<128x2xf32, #tpu.memory_space<vmem>>, vector<128x2xf32>
    %cst_18 = arith.constant dense<0.000000e+00> : vector<16x2xf32>
    %26 = tpu.matmul %24, %25, %cst_18 {dimension_numbers = #tpu.dot_dimension_numbers<[1], [0], [0], [1], [0, 0, 1, 1], [], []>} : vector<16x128xf32>, vector<128x2xf32>, vector<16x2xf32> -> vector<16x2xf32>
    %c0_19 = arith.constant 0 : index
    %c0_20 = arith.constant 0 : index
    %27 = vector.load %arg7[%c0_19, %c0_20] : memref<1x2xf32, #tpu.memory_space<vmem>>, vector<1x2xf32>
    %28 = vector.broadcast %27 : vector<1x2xf32> to vector<16x2xf32>
    %29 = arith.addf %26, %28 : vector<16x2xf32>
    %cst_21 = arith.constant 5.000000e-01 : f32
    %30 = vector.broadcast %cst_21 : f32 to vector<16x2xf32>
    %31 = arith.mulf %30, %29 : vector<16x2xf32>
    %32 = math.tanh %31 : vector<16x2xf32>
    %cst_22 = arith.constant 1.000000e+00 : f32
    %33 = vector.broadcast %cst_22 : f32 to vector<16x2xf32>
    %34 = arith.addf %32, %33 : vector<16x2xf32>
    %cst_23 = arith.constant 5.000000e-01 : f32
    %35 = vector.broadcast %cst_23 : f32 to vector<16x2xf32>
    %36 = arith.mulf %35, %34 : vector<16x2xf32>
    %c0_24 = arith.constant 0 : index
    %c0_25 = arith.constant 0 : index
    %37 = vector.load %arg8[%c0_24, %c0_25] : memref<16x2xf32, #tpu.memory_space<vmem>>, vector<16x2xf32>
    tpu.vector_store %arg8[%c0_24, %c0_25], %36 {strides = array<i32>} : memref<16x2xf32, #tpu.memory_space<vmem>>, vector<16x2xf32>,
    return
  }
  func.func @transform_0(%arg0: i32) -> (i32, i32) {
    %c0_i32 = arith.constant 0 : i32
    %c0_i32_0 = arith.constant 0 : i32
    return %arg0, %c0_i32 : i32, i32
  }
  func.func @transform_1(%arg0: i32) -> (i32, i32) {
    %c0_i32 = arith.constant 0 : i32
    %c0_i32_0 = arith.constant 0 : i32
    %c0_i32_1 = arith.constant 0 : i32
    return %c0_i32, %c0_i32_0 : i32, i32
  }
  func.func @transform_2(%arg0: i32) -> (i32, i32) {
    %c0_i32 = arith.constant 0 : i32
    %c0_i32_0 = arith.constant 0 : i32
    %c0_i32_1 = arith.constant 0 : i32
    return %c0_i32, %c0_i32_0 : i32, i32
  }
  func.func @transform_3(%arg0: i32) -> (i32, i32) {
    %c0_i32 = arith.constant 0 : i32
    %c0_i32_0 = arith.constant 0 : i32
    %c0_i32_1 = arith.constant 0 : i32
    return %c0_i32, %c0_i32_0 : i32, i32
  }
  func.func @transform_4(%arg0: i32) -> (i32, i32) {
    %c0_i32 = arith.constant 0 : i32
    %c0_i32_0 = arith.constant 0 : i32
    %c0_i32_1 = arith.constant 0 : i32
    return %c0_i32, %c0_i32_0 : i32, i32
  }
  func.func @transform_5(%arg0: i32) -> (i32, i32) {
    %c0_i32 = arith.constant 0 : i32
    %c0_i32_0 = arith.constant 0 : i32
    %c0_i32_1 = arith.constant 0 : i32
    return %c0_i32, %c0_i32_0 : i32, i32
  }
  func.func @transform_6(%arg0: i32) -> (i32, i32) {
    %c0_i32 = arith.constant 0 : i32
    %c0_i32_0 = arith.constant 0 : i32
    %c0_i32_1 = arith.constant 0 : i32
    return %c0_i32, %c0_i32_0 : i32, i32
  }
  func.func @transform_7(%arg0: i32) -> (i32, i32) {
    %c0_i32 = arith.constant 0 : i32
    %c0_i32_0 = arith.constant 0 : i32
    return %arg0, %c0_i32 : i32, i32
  }
}

</mosaic_0001>

<bundles_post_ra>
// kernel: generative_model_forward.1
= control target key start
LH: loop header
LB: loop body
LE: loop exit
PB: predicated region body
PF: predicated region fallthrough
CT: control target
= control target key end

     0   :  { %s856_s24 = smov 0   ;;  %s988_s0 = inlined_call_operand.vmem [shape: f32[32,4], index: 0, kind: input, shape index: {}]   ;;  %s989_s1 = inlined_call_operand.vmem [shape: f32[4,128], index: 1, kind: input, shape index: {}]   ;;  %s990_s2 = inlined_call_operand.vmem [shape: f32[1,128], index: 2, kind: input, shape index: {}]   ;;  %s991_s3 = inlined_call_operand.vmem [shape: f32[128,128], index: 3, kind: input, shape index: {}]   ;;  %s992_s4 = inlined_call_operand.vmem [shape: f32[1,128], index: 4, kind: input, shape index: {}]   ;;  %s993_s5 = inlined_call_operand.vmem [shape: f32[128,2], index: 5, kind: input, shape index: {}]   ;;  %s994_s6 = inlined_call_operand.vmem [shape: f32[1,2], index: 6, kind: input, shape index: {}]   ;;  %s995_s7 = inlined_call_operand.vmem [shape: f32[32,2], index: 7, kind: output, shape index: {}]  }
   0x1 LB: > { %s657_s25 = sadd.s32 4294967295, %s814_s24   ;;  %p661_p0 = scmp.ge.s32.totalorder %s814_s24, 1  ;;  %s814_s24 = sphi %s856_s24, %s17_s24  }
   0x2   : > { %p238_p1 = scmp.lt.s32.totalorder %s814_s24, 3 }
   0x4   : > { %p239_p2 = pnand %p661_p0, %p238_p1 }
   0x5   : > { %s662_s28 = sshll.u32 (!%p239_p2), %s657_s25, 1 }
   0x6   : > { %242 = sbr.rel (%p239_p2) target bundleno = 670 (0x29e), region = 48  ;;  %p271_p3 = scmp.lt.s32.totalorder (!%p239_p2), %s662_s28, 3 }
   0xb   : > { %v284_v0 = vld [vmem:[%s989_s1] sm:$0xf]  ;;  %vm299_vm0 = vcmask 1043456   ;;  %v401_v1 = vld [vmem:[%s991_s3 + $0x78] sm:$0xff]  ;;  %v400_v2 = vld [vmem:[%s991_s3 + $0x70] sm:$0xff]  ;;  %s997_s28 = smov (!%p271_p3, %s662_s28), 3 }
   0xc   : > { %713 = vmatprep.subr.msk.mxu0 %vm299_vm0, %v284_v0  ;;  %718 = vmatprep.subr.mxu1 %v401_v1  ;;  %v399_v3 = vld [vmem:[%s991_s3 + $0x68] sm:$0xff]  ;;  %s663_s12 = sshll.u32 %s997_s28, 3  ;;  %vm292_vm1 = vcmask 31744   ;;  %v398_v6 = vld [vmem:[%s991_s3 + $0x60] sm:$0xff]  ;;  %v397_v7 = vld [vmem:[%s991_s3 + $0x58] sm:$0xff]  ;;  %vm598_vm2 = vcmask 15360  }
   0xd   : > { %714 = vmatpush3.msk.msra.mxu0 %vm299_vm0, %v284_v0  ;;  %719 = vmatpush3.msra.mxu1 %v401_v1  ;;  %s274_s15 = scalar_lea.vmem %s988_s0, %s663_s12  ;;  %v396_v8 = vld [vmem:[%s991_s3 + $0x50] sm:$0xff]  ;;  %v395_v9 = vld [vmem:[%s991_s3 + $0x48] sm:$0xff]  ;;  %v394_v10 = vld [vmem:[%s991_s3 + $0x40] sm:$0xff]  ;;  %s280_s22 = scalar_lea.vmem %s995_s7, %s663_s12 }
   0xe   : > { %720 = vmatprep.subr.mxu1 %v400_v2  ;;  %v282_v4 = vld [vmem:[%s274_s15] sm:$0xff]  ;;  %v283_v5 = vld [vmem:[%s274_s15 + $0x8] sm:$0xff]  ;;  %v393_v11 = vld [vmem:[%s991_s3 + $0x38] sm:$0xff] }
   0xf   : > { %721 = vmatpush3.msra.mxu1 %v400_v2  ;;  %715 = vmatprep.mubr.msk.f32.mxu0 %vm292_vm1, %v282_v4  ;;  %v392_v12 = vld [vmem:[%s991_s3 + $0x30] sm:$0xff]  ;;  %v391_v13 = vld [vmem:[%s991_s3 + $0x28] sm:$0xff]  ;;  %v390_v14 = vld [vmem:[%s991_s3 + $0x20] sm:$0xff] }
  0x10   : > { %722 = vmatprep.subr.mxu1 %v399_v3  ;;  %716 = vmatmul.mubr.msk.f32.vlgmr.msra.gmra.mxu0 %vm292_vm1, %v283_v5  ;;  %v389_v15 = vld [vmem:[%s991_s3 + $0x18] sm:$0xff]  ;;  %v388_v16 = vld [vmem:[%s991_s3 + $0x10] sm:$0xff]  ;;  %v387_v17 = vld [vmem:[%s991_s3 + $0x8] sm:$0xff] }
  0x11   : > { %723 = vmatpush3.msra.mxu1 %v399_v3  ;;  %v386_v18 = vld [vmem:[%s991_s3] sm:$0xff]  ;;  %v507_v19 = vld [vmem:[%s993_s5 + $0x78] sm:$0xff]  ;;  %v506_v20 = vld [vmem:[%s993_s5 + $0x70] sm:$0xff] }
  0x12   : > { %724 = vmatprep.subr.mxu1 %v398_v6  ;;  %753 = vmatprep.subr.mxu0 %v507_v19  ;;  %v505_v21 = vld [vmem:[%s993_s5 + $0x68] sm:$0xff]  ;;  %v666_v22 = vld [vmem:[%s990_s2] ss:$0 sm:$0xff]  ;;  %v503_v36 = vld [vmem:[%s993_s5 + $0x58] sm:$0xff] }
  0x13   : > { %725 = vmatpush3.msra.mxu1 %v398_v6  ;;  %754 = vmatpush3.msra.mxu0 %v507_v19  ;;  %v504_v35 = vld [vmem:[%s993_s5 + $0x60] sm:$0xff]  ;;  %v502_v37 = vld [vmem:[%s993_s5 + $0x50] sm:$0xff]  ;;  %v501_v38 = vld [vmem:[%s993_s5 + $0x48] sm:$0xff] }
  0x14   : > { %726 = vmatprep.subr.mxu1 %v397_v7  ;;  %755 = vmatprep.subr.mxu0 %v506_v20  ;;  %v500_v39 = vld [vmem:[%s993_s5 + $0x40] sm:$0xff]  ;;  %v499_v40 = vld [vmem:[%s993_s5 + $0x38] sm:$0xff]  ;;  %v498_v41 = vld [vmem:[%s993_s5 + $0x30] sm:$0xff] }
  0x15   : > { %727 = vmatpush3.msra.mxu1 %v397_v7  ;;  %756 = vmatpush3.msra.mxu0 %v506_v20  ;;  %v497_v42 = vld [vmem:[%s993_s5 + $0x28] sm:$0xff]  ;;  %v496_v43 = vld [vmem:[%s993_s5 + $0x20] sm:$0xff]  ;;  %v495_v44 = vld [vmem:[%s993_s5 + $0x18] sm:$0xff] }
  0x16   : > { %728 = vmatprep.subr.mxu1 %v396_v8  ;;  %757 = vmatprep.subr.mxu0 %v505_v21  ;;  %v494_v45 = vld [vmem:[%s993_s5 + $0x10] sm:$0xff]  ;;  %v493_v46 = vld [vmem:[%s993_s5 + $0x8] sm:$0xff]  ;;  %v492_v47 = vld [vmem:[%s993_s5] sm:$0xff] }
  0x17   : > { %729 = vmatpush3.msra.mxu1 %v396_v8  ;;  %758 = vmatpush3.msra.mxu0 %v505_v21  ;;  %v670_v48 = vld [vmem:[%s992_s4] ss:$0 sm:$0xff] }
  0x18   : > { %730 = vmatprep.subr.mxu1 %v395_v9  ;;  %759 = vmatprep.subr.mxu0 %v504_v35  ;;  %v671_v61 = vld [vmem:[%s994_s6] ss:$0 sm:$0xff] }
  0x19   : > { %731 = vmatpush3.msra.mxu1 %v395_v9  ;;  %760 = vmatpush3.msra.mxu0 %v504_v35 }
  0x1a   : > { %732 = vmatprep.subr.mxu1 %v394_v10  ;;  %761 = vmatprep.subr.mxu0 %v503_v36 }
  0x1b   : > { %733 = vmatpush3.msra.mxu1 %v394_v10  ;;  %762 = vmatpush3.msra.mxu0 %v503_v36 }
  0x1c   : > { %734 = vmatprep.subr.mxu1 %v393_v11  ;;  %763 = vmatprep.subr.mxu0 %v502_v37 }
  0x1d   : > { %735 = vmatpush3.msra.mxu1 %v393_v11  ;;  %764 = vmatpush3.msra.mxu0 %v502_v37 }
  0x1e   : > { %736 = vmatprep.subr.mxu1 %v392_v12  ;;  %765 = vmatprep.subr.mxu0 %v501_v38 }
  0x1f   : > { %737 = vmatpush3.msra.mxu1 %v392_v12  ;;  %766 = vmatpush3.msra.mxu0 %v501_v38 }
  0x20   : > { %738 = vmatprep.subr.mxu1 %v391_v13  ;;  %767 = vmatprep.subr.mxu0 %v500_v39 }
  0x21   : > { %739 = vmatpush3.msra.mxu1 %v391_v13  ;;  %768 = vmatpush3.msra.mxu0 %v500_v39 }
  0x22   : > { %740 = vmatprep.subr.mxu1 %v390_v14  ;;  %769 = vmatprep.subr.mxu0 %v499_v40 }
  0x23   : > { %741 = vmatpush3.msra.mxu1 %v390_v14  ;;  %770 = vmatpush3.msra.mxu0 %v499_v40 }
  0x24   : > { %742 = vmatprep.subr.mxu1 %v389_v15  ;;  %771 = vmatprep.subr.mxu0 %v498_v41 }
  0x25   : > { %743 = vmatpush3.msra.mxu1 %v389_v15  ;;  %772 = vmatpush3.msra.mxu0 %v498_v41 }
  0x26   : > { %744 = vmatprep.subr.mxu1 %v388_v16  ;;  %773 = vmatprep.subr.mxu0 %v497_v42 }
  0x27   : > { %745 = vmatpush3.msra.mxu1 %v388_v16  ;;  %774 = vmatpush3.msra.mxu0 %v497_v42 }
  0x28   : > { %746 = vmatprep.subr.mxu1 %v387_v17  ;;  %775 = vmatprep.subr.mxu0 %v496_v43 }
  0x29   : > { %747 = vmatpush3.msra.mxu1 %v387_v17  ;;  %776 = vmatpush3.msra.mxu0 %v496_v43 }
  0x2a   : > { %748 = vmatprep.subr.mxu1 %v386_v18  ;;  %777 = vmatprep.subr.mxu0 %v495_v44 }
  0x2b   : > { %749 = vmatpush3.msra.mxu1 %v386_v18  ;;  %778 = vmatpush3.msra.mxu0 %v495_v44 }
  0x2c   : > { %779 = vmatprep.subr.mxu0 %v494_v45 }
  0x2d   : > { %780 = vmatpush3.msra.mxu0 %v494_v45 }
  0x2e   : > { %781 = vmatprep.subr.mxu0 %v493_v46 }
  0x2f   : > { %782 = vmatpush3.msra.mxu0 %v493_v46 }
  0x30   : > { %783 = vmatprep.subr.mxu0 %v492_v47 }
  0x31   : > { %784 = vmatpush3.msra.mxu0 %v492_v47 }
  0xd0   : > { %v717_v23 = vpop.f32.mrf.mxu0 }
  0xd1   : > { %v375_v24 = vadd.f32 %v717_v23, %v666_v22 }
  0xd2   : > { %v369_v25 = vpop.f32.mrf.mxu0 }
  0xd3   : > { %v379_v26 = vmul.f32 0.5, %v375_v24  ;;  %v370_v27 = vadd.f32 %v666_v22, %v369_v25 }
  0xd5   : > { %796 = vtanh.f32 %v379_v26  ;;  %v378_v28 = vmul.f32 0.5, %v370_v27 }
  0xd7   : > { %798 = vtanh.f32 %v378_v28 }
  0xe2   : > { %v797_v29 = vpop.eup %796 }
  0xe3   : > { %v383_v31 = vadd.f32 1.0, %v797_v29 }
  0xe4   : > { %v799_v30 = vpop.eup %798 }
  0xe5   : > { %v382_v32 = vadd.f32 1.0, %v799_v30  ;;  %v385_v34 = vmul.f32 0.5, %v383_v31 }
  0xe7   : > { %v384_v33 = vmul.f32 0.5, %v382_v32 }
  0xe9   : > { %750 = vmatprep.mubr.f32.mxu1 %v384_v33 }
  0xea   : > { %751 = vmatmul.mubr.f32.vlgmr.msra.gmra.mxu1 %v385_v34 }
 0x1aa   : > { %v752_v49 = vpop.f32.mrf.mxu1 }
 0x1ab   : > { %v481_v50 = vadd.f32 %v752_v49, %v670_v48 }
 0x1ac   : > { %v475_v51 = vpop.f32.mrf.mxu1 }
 0x1ad   : > { %v485_v52 = vmul.f32 0.5, %v481_v50  ;;  %v476_v53 = vadd.f32 %v670_v48, %v475_v51 }
 0x1af   : > { %800 = vtanh.f32 %v485_v52  ;;  %v484_v54 = vmul.f32 0.5, %v476_v53 }
 0x1b1   : > { %802 = vtanh.f32 %v484_v54 }
 0x1bc   : > { %v801_v55 = vpop.eup %800 }
 0x1bd   : > { %v489_v57 = vadd.f32 1.0, %v801_v55 }
 0x1be   : > { %v803_v56 = vpop.eup %802 }
 0x1bf   : > { %v488_v58 = vadd.f32 1.0, %v803_v56  ;;  %v491_v60 = vmul.f32 0.5, %v489_v57 }
 0x1c1   : > { %v490_v59 = vmul.f32 0.5, %v488_v58 }
 0x1c3   : > { %785 = vmatprep.mubr.f32.mxu0 %v490_v59 }
 0x1c4   : > { %786 = vmatmul.mubr.f32.vlgmr.msra.gmra.mxu0 %v491_v60 }
 0x284   : > { %v787_v62 = vpop.f32.mrf.mxu0 }
 0x285   : > { %v587_v63 = vadd.f32 %v787_v62, %v671_v61 }
 0x286   : > { %v581_v0 = vpop.f32.mrf.mxu0 }
 0x287   : > { %v591_v1 = vmul.f32 0.5, %v587_v63  ;;  %v582_v2 = vadd.f32 %v671_v61, %v581_v0 }
 0x289   : > { %804 = vtanh.f32 %v591_v1  ;;  %v590_v3 = vmul.f32 0.5, %v582_v2 }
 0x28b   : > { %806 = vtanh.f32 %v590_v3 }
 0x296   : > { %v805_v4 = vpop.eup %804 }
 0x297   : > { %v595_v6 = vadd.f32 1.0, %v805_v4 }
 0x298   : > { %v807_v5 = vpop.eup %806 }
 0x299   : > { %v594_v7 = vadd.f32 1.0, %v807_v5  ;;  %v597_v9 = vmul.f32 0.5, %v595_v6 }
 0x29b   : > { %v596_v8 = vmul.f32 0.5, %v594_v7  ;;  %600 = vst.msk [vmem:[%s280_s22 + $0x8] sm:$0xff] %vm598_vm2, %v597_v9 }
 0x29d   : > { %599 = vst.msk [vmem:[%s280_s22] sm:$0xff] %vm598_vm2, %v596_v8 }
 0x29e PF: > { %s17_s24 = sadd.s32 1, %s814_s24  }
 0x29f   : > { %p14_p4 = scmp.ge.s32.totalorder %s17_s24, 4  }
 0x2a1   :  { %16 = sbr.rel (!%p14_p4) target bundleno = 1 (0x1), region = 78 }

</bundles_post_ra>
